<compile_context>
chip_gen: v7x
topology: tpu7x:2x2x1
jax: 0.10.0
libtpu: 0.0.40
codegen_flags: <defaults>
</compile_context>

<pallas_src>
import functools

import jax
import jax.numpy as jnp
from jax.experimental import pallas as pl
from jax.experimental.pallas import tpu as pltpu


# ---------------------------------------------------------------------------
# Fused kernel: Rounding + class-code modulation + 1x1x1 Conv3d (both branches).
# ---------------------------------------------------------------------------
def _fused_kernel(b_ref, s_ref, sw_ref, su_ref, swu_ref, x_ref, xu_ref,
                  *out_refs, do_round):
    if do_round:
        rnd_ref, rndu_ref, mod_ref, modu_ref, gen_ref, genu_ref = out_refs
    else:
        mod_ref, modu_ref, gen_ref, genu_ref = out_refs
        rnd_ref = rndu_ref = None

    bias = b_ref[0, 0]                                   # SMEM scalar

    def branch(x_r, s_r, sw_r, rnd_r, mod_r, gen_r):
        x = x_r[0]                                       # (C, D, THW)
        if do_round:
            # Rounding.forward: x + (-x if x <= 0.5 else 1 - x)
            x = x + jnp.where(x <= 0.5, -x, 1.0 - x)
            rnd_r[0] = x.astype(rnd_r.dtype)
        s = s_r[0]                                       # (C, D, 1) lane-broadcast
        sw = sw_r[0]                                     # (C, D, 1) scale * conv weight
        mod_r[0] = (x * s).astype(mod_r.dtype)
        # Conv3d(kernel_size=1, out_channels=1): channel reduction (major-axis adds).
        gen_r[0] = (jnp.sum(x * sw, axis=0, keepdims=True) + bias).astype(gen_r.dtype)

    branch(x_ref, s_ref, sw_ref, rnd_ref, mod_ref, gen_ref)
    branch(xu_ref, su_ref, swu_ref, rndu_ref, modu_ref, genu_ref)


def fused_round_modulate_generate(x, x_u, scale, scale_u, gen_w, gen_b, *, do_round):
    """x, x_u: [B, C, D, HW] f32; scale, scale_u: [B, C, D]; gen_w: [C, 1]; gen_b: [1, 1].

    Returns (rounded, rounded_u, modulated, modulated_u, gen, gen_u); the rounded
    outputs are None when do_round is False (not emitted -> no HBM write).
    """
    B, C, D, HW = x.shape
    itemsize = x.dtype.itemsize

    # Tiny O(B*C*D) prep in JAX: trailing size-1 lane dim + weight-premultiplied scale.
    w = gen_w.reshape(1, C, 1).astype(x.dtype)
    s4 = scale.reshape(B, C, D, 1).astype(x.dtype)
    su4 = scale_u.reshape(B, C, D, 1).astype(x.dtype)
    sw4 = (scale * w).reshape(B, C, D, 1).astype(x.dtype)
    swu4 = (scale_u * w).reshape(B, C, D, 1).astype(x.dtype)

    # --- lane-dim (H*W) tile size from a VMEM byte budget -------------------
    # Double-buffered bytes per lane column, both branches:
    #   per branch: x in (2x) + modulated out (2x) [+ rounded out (2x)] of C*D,
    #               + gen out (2x) of D.
    per_lane = 2 * (2 * (2 + (1 if do_round else 0)) * C * D + 2 * D) * itemsize
    budget = 16 << 20                    # blockspec buffers; headroom left under the 32 MiB limit
    thw = min(HW, max(1, budget // max(per_lane, 1)))
    if thw < HW:
        thw = max(128, (thw // 128) * 128)       # lane-dense 128-multiple (or full HW)
    n_hw = pl.cdiv(HW, thw)
    # Guarantee >= 2 grid steps so v7x's two TensorCores both get work.
    if B * n_hw < 2 and HW >= 256:
        thw = max(128, ((pl.cdiv(HW, 2) + 127) // 128) * 128)
        n_hw = pl.cdiv(HW, thw)

    x_spec = pl.BlockSpec((1, C, D, thw), lambda b, j: (b, 0, 0, j))
    s_spec = pl.BlockSpec((1, C, D, 1), lambda b, j: (b, 0, 0, 0))
    gen_spec = pl.BlockSpec((1, 1, D, thw), lambda b, j: (b, 0, 0, j))

    in_specs = [
        pl.BlockSpec(memory_space=pltpu.MemorySpace.SMEM),   # conv bias (scalar)
        s_spec, s_spec, s_spec, s_spec,                      # s, s*w, s_u, s_u*w
        x_spec, x_spec,                                      # x, x_u
    ]

    out_shape = []
    out_specs = []
    if do_round:
        out_shape += [jax.ShapeDtypeStruct((B, C, D, HW), x.dtype)] * 2
        out_specs += [x_spec, x_spec]
    out_shape += [jax.ShapeDtypeStruct((B, C, D, HW), x.dtype)] * 2      # modulated
    out_specs += [x_spec, x_spec]
    out_shape += [jax.ShapeDtypeStruct((B, 1, D, HW), x.dtype)] * 2      # generated
    out_specs += [gen_spec, gen_spec]

    V = B * C * D * HW
    flops = int((5 if do_round else 3) * 2 * V)
    bytes_accessed = int(
        (2 * V                                   # two inputs
         + (2 + (2 if do_round else 0)) * V      # modulated (+ rounded) outputs
         + 2 * B * D * HW                        # generated outputs
         + 4 * B * C * D + 1) * itemsize)

    kernel = functools.partial(_fused_kernel, do_round=do_round)
    outs = pl.pallas_call(
        kernel,
        out_shape=tuple(out_shape),
        grid_spec=pltpu.PrefetchScalarGridSpec(
            num_scalar_prefetch=0,
            grid=(B, n_hw),
            in_specs=in_specs,
            out_specs=out_specs,
        ),
        compiler_params=pltpu.CompilerParams(
            dimension_semantics=("parallel", "parallel"),
            vmem_limit_bytes=32 << 20),
        cost_estimate=pl.CostEstimate(flops=flops, transcendentals=0,
                                      bytes_accessed=bytes_accessed),
    )(gen_b.astype(x.dtype), s4, sw4, su4, swu4, x, x_u)

    if do_round:
        rnd, rnd_u, mod, mod_u, gen, gen_u = outs
    else:
        mod, mod_u, gen, gen_u = outs
        rnd, rnd_u = None, None
    return rnd, rnd_u, mod, mod_u, gen, gen_u


# ---------------------------------------------------------------------------
# ULordModelNew forward (dim == 3 path), defined pieces only.
# ---------------------------------------------------------------------------
class ULordModelPallas:
    def __init__(self, config, config_unet, dim, key):
        assert dim == 3, "only the 3-D path (GeneratorS3D) is implemented"
        # The original forward's class_code.T.view(B, C, D, 1, 1) is only
        # shape-valid when class_dim == config_unet['out_channels'].
        assert config['class_dim'] == config_unet['out_channels']
        self.config = config
        self.config_unet = config_unet
        self.dim = dim
        k1, k2, k3 = jax.random.split(key, 3)
        # nn.Embedding(n_classes, class_dim), uniform(-0.05, 0.05) as in weights_init.
        self.class_embedding = jax.random.uniform(
            k1, (config['n_classes'], config['class_dim']),
            minval=-0.05, maxval=0.05, dtype=jnp.float32)
        # GeneratorS3D: Conv3d(in=out_channels, out=1, kernel_size=1, padding=0).
        c = config_unet['out_channels']
        self.gen_w = (jax.random.normal(k2, (c, 1), dtype=jnp.float32) * 0.1)
        self.gen_b = (jax.random.normal(k3, (1, 1), dtype=jnp.float32) * 0.1)
        # TODO(synk): Modulation is constructed in __init__ but never called in forward; omitted.

    def __call__(self, img, class_id, img_u, class_id_u):
        B, C, D, H, W = img.shape
        class_id = jnp.repeat(class_id, D)           # torch.repeat_interleave(depth)
        class_id_u = jnp.repeat(class_id_u, D)

        # TODO(synk): UNet ('generator_antomy') is not defined in the provided spec; identity placeholder.
        anatomy = img
        anatomy_u = img_u

        class_code = jnp.take(self.class_embedding, class_id, axis=0)
        class_code_u = jnp.take(self.class_embedding, class_id_u, axis=0)

        # class_code.T.contiguous().view(B, C, D, 1, 1) (matches in-file reference; see notes).
        scale = jnp.transpose(class_code).reshape(B, C, D)
        scale_u = jnp.transpose(class_code_u).reshape(B, C, D)

        HW = H * W
        x = anatomy.reshape(B, C, D, HW)             # free, lane-dense slab
        x_u = anatomy_u.reshape(B, C, D, HW)

        do_round = bool(self.config['round'])
        rnd, rnd_u, mod, mod_u, gen, gen_u = fused_round_modulate_generate(
            x, x_u, scale, scale_u, self.gen_w, self.gen_b, do_round=do_round)

        if do_round:
            content_code = rnd.reshape(B, C * D * H * W)       # nn.Flatten
            content_code_u = rnd_u.reshape(B, C * D * H * W)
        else:
            content_code = anatomy.reshape(B, C * D * H * W)   # no extra HBM write needed
            content_code_u = anatomy_u.reshape(B, C * D * H * W)

        anatomy_mod = mod.reshape(B, C, D, H, W)
        anatomy_mod_u = mod_u.reshape(B, C, D, H, W)
        generated = gen.reshape(B, 1, D, H, W)
        generated_u = gen_u.reshape(B, 1, D, H, W)

        # Note: config['segmentor_gard'] only toggles .detach() (autograd-only, no forward effect).
        return {
            'img': generated, 'img_u': generated_u,
            'anatomy_img': anatomy_mod, 'anatomy_img_u': anatomy_mod_u,
            # TODO(synk): Segmentntor is not defined in the provided spec; mask outputs omitted.
            'mask': None, 'mask_u': None,
            'class_code': class_code, 'class_code_u': class_code_u,
            'content_code': content_code, 'content_code_u': content_code_u,
        }


# ---------------------------------------------------------------------------
# Plain-JAX reference for correctness checking.
# ---------------------------------------------------------------------------
def _reference_branch(anatomy, class_code, gen_w, gen_b, do_round):
    B, C, D, H, W = anatomy.shape
    if do_round:
        anatomy = anatomy + jnp.where(anatomy <= 0.5, -anatomy, 1.0 - anatomy)
    content = anatomy.reshape(B, -1)
    scale = jnp.transpose(class_code).reshape(B, C, D, 1, 1)
    mod = anatomy * scale
    gen = jnp.sum(mod * gen_w.reshape(1, C, 1, 1, 1), axis=1, keepdims=True) + gen_b[0, 0]
    return gen, mod, content


def _reference_forward(model, img, class_id, img_u, class_id_u):
    depth = img.shape[2]
    cid = jnp.repeat(class_id, depth)
    cid_u = jnp.repeat(class_id_u, depth)
    cc = jnp.take(model.class_embedding, cid, axis=0)
    cc_u = jnp.take(model.class_embedding, cid_u, axis=0)
    do_round = bool(model.config['round'])
    g, m, c = _reference_branch(img, cc, model.gen_w, model.gen_b, do_round)
    gu, mu, cu = _reference_branch(img_u, cc_u, model.gen_w, model.gen_b, do_round)
    return {'img': g, 'img_u': gu, 'anatomy_img': m, 'anatomy_img_u': mu,
            'class_code': cc, 'class_code_u': cc_u,
            'content_code': c, 'content_code_u': cu}


def _check(out, ref):
    for name in ['img', 'img_u', 'anatomy_img', 'anatomy_img_u',
                 'class_code', 'class_code_u', 'content_code', 'content_code_u']:
        assert out[name].shape == ref[name].shape, name
        assert out[name].dtype == ref[name].dtype, name
        assert jnp.allclose(out[name], ref[name], atol=1e-5, rtol=1e-5), name


if __name__ == "__main__":
    key = jax.random.PRNGKey(0)
    config = {'class_dim': 8, 'n_adain_layers': 2, 'adain_dim': 16,
              'n_classes': 5, 'round': True, 'segmentor_gard': True}
    config_unet = {'out_channels': 8}

    k_model, k_img, k_img_u, k_cls, k_cls_u = jax.random.split(key, 5)
    model = ULordModelPallas(config, config_unet, dim=3, key=k_model)

    B, C, D, H, W = 2, config_unet['out_channels'], 4, 16, 16
    img = jax.random.uniform(k_img, (B, C, D, H, W), dtype=jnp.float32)
    img_u = jax.random.uniform(k_img_u, (B, C, D, H, W), dtype=jnp.float32)
    class_id = jax.random.randint(k_cls, (B,), 0, config['n_classes'])
    class_id_u = jax.random.randint(k_cls_u, (B,), 0, config['n_classes'])

    # round=True path (rounded outputs emitted and used as content_code).
    out = jax.block_until_ready(model(img, class_id, img_u, class_id_u))
    _check(out, _reference_forward(model, img, class_id, img_u, class_id_u))

    # round=False path (rounded outputs are not emitted at all).
    model.config = dict(config, round=False)
    out2 = jax.block_until_ready(model(img, class_id, img_u, class_id_u))
    _check(out2, _reference_forward(model, img, class_id, img_u, class_id_u))

    print("KERNEL_OK")
</pallas_src>

<mosaic_0001>
module attributes {stable_mosaic.version = 11 : i64} {
  func.func @_fused_kernel(%arg0: i32, %arg1: i32, %arg2: memref<1x1xf32, #tpu.memory_space<smem>>, %arg3: memref<1x8x4x1xf32, #tpu.memory_space<vmem>>, %arg4: memref<1x8x4x1xf32, #tpu.memory_space<vmem>>, %arg5: memref<1x8x4x1xf32, #tpu.memory_space<vmem>>, %arg6: memref<1x8x4x1xf32, #tpu.memory_space<vmem>>, %arg7: memref<1x8x4x256xf32, #tpu.memory_space<vmem>>, %arg8: memref<1x8x4x256xf32, #tpu.memory_space<vmem>>, %arg9: memref<1x8x4x256xf32, #tpu.memory_space<vmem>>, %arg10: memref<1x8x4x256xf32, #tpu.memory_space<vmem>>, %arg11: memref<1x8x4x256xf32, #tpu.memory_space<vmem>>, %arg12: memref<1x8x4x256xf32, #tpu.memory_space<vmem>>, %arg13: memref<1x1x4x256xf32, #tpu.memory_space<vmem>>, %arg14: memref<1x1x4x256xf32, #tpu.memory_space<vmem>>) attributes {dimension_semantics = [#tpu.dimension_semantics<parallel>, #tpu.dimension_semantics<parallel>], iteration_bounds = array<i64: 2, 1>, scalar_prefetch = 0 : i64, scratch_operands = 0 : i64, tpu.core_type = #tpu.core_type<tc>, window_params = [{transform_indices = @transform_0, window_bounds = array<i64: 1, 1>}, {transform_indices = @transform_1, window_bounds = array<i64: 1, 8, 4, 1>}, {transform_indices = @transform_2, window_bounds = array<i64: 1, 8, 4, 1>}, {transform_indices = @transform_3, window_bounds = array<i64: 1, 8, 4, 1>}, {transform_indices = @transform_4, window_bounds = array<i64: 1, 8, 4, 1>}, {transform_indices = @transform_5, window_bounds = array<i64: 1, 8, 4, 256>}, {transform_indices = @transform_6, window_bounds = array<i64: 1, 8, 4, 256>}, {transform_indices = @transform_7, window_bounds = array<i64: 1, 8, 4, 256>}, {transform_indices = @transform_8, window_bounds = array<i64: 1, 8, 4, 256>}, {transform_indices = @transform_9, window_bounds = array<i64: 1, 8, 4, 256>}, {transform_indices = @transform_10, window_bounds = array<i64: 1, 8, 4, 256>}, {transform_indices = @transform_11, window_bounds = array<i64: 1, 1, 4, 256>}, {transform_indices = @transform_12, window_bounds = array<i64: 1, 1, 4, 256>}]} {
    %c0 = arith.constant 0 : index
    %c0_0 = arith.constant 0 : index
    %0 = memref.load %arg2[%c0, %c0_0] : memref<1x1xf32, #tpu.memory_space<smem>>
    %c0_1 = arith.constant 0 : index
    %c0_2 = arith.constant 0 : index
    %c0_3 = arith.constant 0 : index
    %c0_4 = arith.constant 0 : index
    %1 = vector.load %arg7[%c0_1, %c0_2, %c0_3, %c0_4] : memref<1x8x4x256xf32, #tpu.memory_space<vmem>>, vector<1x8x4x256xf32>
    %2 = vector.shape_cast %1 : vector<1x8x4x256xf32> to vector<8x4x256xf32>
    %cst = arith.constant 5.000000e-01 : f32
    %3 = vector.broadcast %cst : f32 to vector<8x4x256xf32>
    %4 = arith.cmpf ole, %2, %3 : vector<8x4x256xf32>
    %cst_5 = arith.constant 0.000000e+00 : f32
    %5 = vector.broadcast %cst_5 : f32 to vector<8x4x256xf32>
    %6 = arith.subf %5, %2 : vector<8x4x256xf32>
    %cst_6 = arith.constant 1.000000e+00 : f32
    %7 = vector.broadcast %cst_6 : f32 to vector<8x4x256xf32>
    %8 = arith.subf %7, %2 : vector<8x4x256xf32>
    %9 = arith.select %4, %6, %8 : vector<8x4x256xi1>, vector<8x4x256xf32>
    %10 = arith.addf %2, %9 : vector<8x4x256xf32>
    %c0_7 = arith.constant 0 : index
    %c0_8 = arith.constant 0 : index
    %c0_9 = arith.constant 0 : index
    %c0_10 = arith.constant 0 : index
    %11 = vector.load %arg9[%c0_7, %c0_8, %c0_9, %c0_10] : memref<1x8x4x256xf32, #tpu.memory_space<vmem>>, vector<1x8x4x256xf32>
    %12 = vector.shape_cast %11 : vector<1x8x4x256xf32> to vector<8x4x256xf32>
    %13 = vector.shape_cast %10 : vector<8x4x256xf32> to vector<1x8x4x256xf32>
    tpu.vector_store %arg9[%c0_7, %c0_8, %c0_9, %c0_10], %13 {strides = array<i32>} : memref<1x8x4x256xf32, #tpu.memory_space<vmem>>, vector<1x8x4x256xf32>,
    %c0_11 = arith.constant 0 : index
    %c0_12 = arith.constant 0 : index
    %c0_13 = arith.constant 0 : index
    %c0_14 = arith.constant 0 : index
    %14 = vector.load %arg3[%c0_11, %c0_12, %c0_13, %c0_14] : memref<1x8x4x1xf32, #tpu.memory_space<vmem>>, vector<1x8x4x1xf32>
    %15 = vector.shape_cast %14 : vector<1x8x4x1xf32> to vector<8x4x1xf32>
    %c0_15 = arith.constant 0 : index
    %c0_16 = arith.constant 0 : index
    %c0_17 = arith.constant 0 : index
    %c0_18 = arith.constant 0 : index
    %16 = vector.load %arg4[%c0_15, %c0_16, %c0_17, %c0_18] : memref<1x8x4x1xf32, #tpu.memory_space<vmem>>, vector<1x8x4x1xf32>
    %17 = vector.shape_cast %16 : vector<1x8x4x1xf32> to vector<8x4x1xf32>
    %18 = vector.broadcast %15 : vector<8x4x1xf32> to vector<8x4x256xf32>
    %19 = arith.mulf %10, %18 : vector<8x4x256xf32>
    %c0_19 = arith.constant 0 : index
    %c0_20 = arith.constant 0 : index
    %c0_21 = arith.constant 0 : index
    %c0_22 = arith.constant 0 : index
    %20 = vector.load %arg11[%c0_19, %c0_20, %c0_21, %c0_22] : memref<1x8x4x256xf32, #tpu.memory_space<vmem>>, vector<1x8x4x256xf32>
    %21 = vector.shape_cast %20 : vector<1x8x4x256xf32> to vector<8x4x256xf32>
    %22 = vector.shape_cast %19 : vector<8x4x256xf32> to vector<1x8x4x256xf32>
    tpu.vector_store %arg11[%c0_19, %c0_20, %c0_21, %c0_22], %22 {strides = array<i32>} : memref<1x8x4x256xf32, #tpu.memory_space<vmem>>, vector<1x8x4x256xf32>,
    %23 = vector.broadcast %17 : vector<8x4x1xf32> to vector<8x4x256xf32>
    %24 = arith.mulf %10, %23 : vector<8x4x256xf32>
    %cst_23 = arith.constant dense<0.000000e+00> : vector<4x256xf32>
    %25 = vector.multi_reduction <add>, %24, %cst_23 [0] : vector<8x4x256xf32> to vector<4x256xf32>
    %26 = vector.shape_cast %25 : vector<4x256xf32> to vector<1x4x256xf32>
    %27 = vector.broadcast %0 : f32 to vector<1x4x256xf32>
    %28 = arith.addf %26, %27 : vector<1x4x256xf32>
    %c0_24 = arith.constant 0 : index
    %c0_25 = arith.constant 0 : index
    %c0_26 = arith.constant 0 : index
    %c0_27 = arith.constant 0 : index
    %29 = vector.load %arg13[%c0_24, %c0_25, %c0_26, %c0_27] : memref<1x1x4x256xf32, #tpu.memory_space<vmem>>, vector<1x1x4x256xf32>
    %30 = vector.shape_cast %29 : vector<1x1x4x256xf32> to vector<1x4x256xf32>
    %31 = vector.shape_cast %28 : vector<1x4x256xf32> to vector<1x1x4x256xf32>
    tpu.vector_store %arg13[%c0_24, %c0_25, %c0_26, %c0_27], %31 {strides = array<i32>} : memref<1x1x4x256xf32, #tpu.memory_space<vmem>>, vector<1x1x4x256xf32>,
    %c0_28 = arith.constant 0 : index
    %c0_29 = arith.constant 0 : index
    %c0_30 = arith.constant 0 : index
    %c0_31 = arith.constant 0 : index
    %32 = vector.load %arg8[%c0_28, %c0_29, %c0_30, %c0_31] : memref<1x8x4x256xf32, #tpu.memory_space<vmem>>, vector<1x8x4x256xf32>
    %33 = vector.shape_cast %32 : vector<1x8x4x256xf32> to vector<8x4x256xf32>
    %cst_32 = arith.constant 5.000000e-01 : f32
    %34 = vector.broadcast %cst_32 : f32 to vector<8x4x256xf32>
    %35 = arith.cmpf ole, %33, %34 : vector<8x4x256xf32>
    %cst_33 = arith.constant 0.000000e+00 : f32
    %36 = vector.broadcast %cst_33 : f32 to vector<8x4x256xf32>
    %37 = arith.subf %36, %33 : vector<8x4x256xf32>
    %cst_34 = arith.constant 1.000000e+00 : f32
    %38 = vector.broadcast %cst_34 : f32 to vector<8x4x256xf32>
    %39 = arith.subf %38, %33 : vector<8x4x256xf32>
    %40 = arith.select %35, %37, %39 : vector<8x4x256xi1>, vector<8x4x256xf32>
    %41 = arith.addf %33, %40 : vector<8x4x256xf32>
    %c0_35 = arith.constant 0 : index
    %c0_36 = arith.constant 0 : index
    %c0_37 = arith.constant 0 : index
    %c0_38 = arith.constant 0 : index
    %42 = vector.load %arg10[%c0_35, %c0_36, %c0_37, %c0_38] : memref<1x8x4x256xf32, #tpu.memory_space<vmem>>, vector<1x8x4x256xf32>
    %43 = vector.shape_cast %42 : vector<1x8x4x256xf32> to vector<8x4x256xf32>
    %44 = vector.shape_cast %41 : vector<8x4x256xf32> to vector<1x8x4x256xf32>
    tpu.vector_store %arg10[%c0_35, %c0_36, %c0_37, %c0_38], %44 {strides = array<i32>} : memref<1x8x4x256xf32, #tpu.memory_space<vmem>>, vector<1x8x4x256xf32>,
    %c0_39 = arith.constant 0 : index
    %c0_40 = arith.constant 0 : index
    %c0_41 = arith.constant 0 : index
    %c0_42 = arith.constant 0 : index
    %45 = vector.load %arg5[%c0_39, %c0_40, %c0_41, %c0_42] : memref<1x8x4x1xf32, #tpu.memory_space<vmem>>, vector<1x8x4x1xf32>
    %46 = vector.shape_cast %45 : vector<1x8x4x1xf32> to vector<8x4x1xf32>
    %c0_43 = arith.constant 0 : index
    %c0_44 = arith.constant 0 : index
    %c0_45 = arith.constant 0 : index
    %c0_46 = arith.constant 0 : index
    %47 = vector.load %arg6[%c0_43, %c0_44, %c0_45, %c0_46] : memref<1x8x4x1xf32, #tpu.memory_space<vmem>>, vector<1x8x4x1xf32>
    %48 = vector.shape_cast %47 : vector<1x8x4x1xf32> to vector<8x4x1xf32>
    %49 = vector.broadcast %46 : vector<8x4x1xf32> to vector<8x4x256xf32>
    %50 = arith.mulf %41, %49 : vector<8x4x256xf32>
    %c0_47 = arith.constant 0 : index
    %c0_48 = arith.constant 0 : index
    %c0_49 = arith.constant 0 : index
    %c0_50 = arith.constant 0 : index
    %51 = vector.load %arg12[%c0_47, %c0_48, %c0_49, %c0_50] : memref<1x8x4x256xf32, #tpu.memory_space<vmem>>, vector<1x8x4x256xf32>
    %52 = vector.shape_cast %51 : vector<1x8x4x256xf32> to vector<8x4x256xf32>
    %53 = vector.shape_cast %50 : vector<8x4x256xf32> to vector<1x8x4x256xf32>
    tpu.vector_store %arg12[%c0_47, %c0_48, %c0_49, %c0_50], %53 {strides = array<i32>} : memref<1x8x4x256xf32, #tpu.memory_space<vmem>>, vector<1x8x4x256xf32>,
    %54 = vector.broadcast %48 : vector<8x4x1xf32> to vector<8x4x256xf32>
    %55 = arith.mulf %41, %54 : vector<8x4x256xf32>
    %cst_51 = arith.constant dense<0.000000e+00> : vector<4x256xf32>
    %56 = vector.multi_reduction <add>, %55, %cst_51 [0] : vector<8x4x256xf32> to vector<4x256xf32>
    %57 = vector.shape_cast %56 : vector<4x256xf32> to vector<1x4x256xf32>
    %58 = vector.broadcast %0 : f32 to vector<1x4x256xf32>
    %59 = arith.addf %57, %58 : vector<1x4x256xf32>
    %c0_52 = arith.constant 0 : index
    %c0_53 = arith.constant 0 : index
    %c0_54 = arith.constant 0 : index
    %c0_55 = arith.constant 0 : index
    %60 = vector.load %arg14[%c0_52, %c0_53, %c0_54, %c0_55] : memref<1x1x4x256xf32, #tpu.memory_space<vmem>>, vector<1x1x4x256xf32>
    %61 = vector.shape_cast %60 : vector<1x1x4x256xf32> to vector<1x4x256xf32>
    %62 = vector.shape_cast %59 : vector<1x4x256xf32> to vector<1x1x4x256xf32>
    tpu.vector_store %arg14[%c0_52, %c0_53, %c0_54, %c0_55], %62 {strides = array<i32>} : memref<1x1x4x256xf32, #tpu.memory_space<vmem>>, vector<1x1x4x256xf32>,
    return
  }
  func.func @transform_0(%arg0: i32, %arg1: i32) -> (i32, i32) {
    %c0_i32 = arith.constant 0 : i32
    %c0_i32_0 = arith.constant 0 : i32
    %c0_i32_1 = arith.constant 0 : i32
    return %c0_i32, %c0_i32_0 : i32, i32
  }
  func.func @transform_1(%arg0: i32, %arg1: i32) -> (i32, i32, i32, i32) {
    %c0_i32 = arith.constant 0 : i32
    %c0_i32_0 = arith.constant 0 : i32
    %c0_i32_1 = arith.constant 0 : i32
    %c0_i32_2 = arith.constant 0 : i32
    return %arg0, %c0_i32, %c0_i32_0, %c0_i32_1 : i32, i32, i32, i32
  }
  func.func @transform_2(%arg0: i32, %arg1: i32) -> (i32, i32, i32, i32) {
    %c0_i32 = arith.constant 0 : i32
    %c0_i32_0 = arith.constant 0 : i32
    %c0_i32_1 = arith.constant 0 : i32
    %c0_i32_2 = arith.constant 0 : i32
    return %arg0, %c0_i32, %c0_i32_0, %c0_i32_1 : i32, i32, i32, i32
  }
  func.func @transform_3(%arg0: i32, %arg1: i32) -> (i32, i32, i32, i32) {
    %c0_i32 = arith.constant 0 : i32
    %c0_i32_0 = arith.constant 0 : i32
    %c0_i32_1 = arith.constant 0 : i32
    %c0_i32_2 = arith.constant 0 : i32
    return %arg0, %c0_i32, %c0_i32_0, %c0_i32_1 : i32, i32, i32, i32
  }
  func.func @transform_4(%arg0: i32, %arg1: i32) -> (i32, i32, i32, i32) {
    %c0_i32 = arith.constant 0 : i32
    %c0_i32_0 = arith.constant 0 : i32
    %c0_i32_1 = arith.constant 0 : i32
    %c0_i32_2 = arith.constant 0 : i32
    return %arg0, %c0_i32, %c0_i32_0, %c0_i32_1 : i32, i32, i32, i32
  }
  func.func @transform_5(%arg0: i32, %arg1: i32) -> (i32, i32, i32, i32) {
    %c0_i32 = arith.constant 0 : i32
    %c0_i32_0 = arith.constant 0 : i32
    %c0_i32_1 = arith.constant 0 : i32
    return %arg0, %c0_i32, %c0_i32_0, %arg1 : i32, i32, i32, i32
  }
  func.func @transform_6(%arg0: i32, %arg1: i32) -> (i32, i32, i32, i32) {
    %c0_i32 = arith.constant 0 : i32
    %c0_i32_0 = arith.constant 0 : i32
    %c0_i32_1 = arith.constant 0 : i32
    return %arg0, %c0_i32, %c0_i32_0, %arg1 : i32, i32, i32, i32
  }
  func.func @transform_7(%arg0: i32, %arg1: i32) -> (i32, i32, i32, i32) {
    %c0_i32 = arith.constant 0 : i32
    %c0_i32_0 = arith.constant 0 : i32
    %c0_i32_1 = arith.constant 0 : i32
    return %arg0, %c0_i32, %c0_i32_0, %arg1 : i32, i32, i32, i32
  }
  func.func @transform_8(%arg0: i32, %arg1: i32) -> (i32, i32, i32, i32) {
    %c0_i32 = arith.constant 0 : i32
    %c0_i32_0 = arith.constant 0 : i32
    %c0_i32_1 = arith.constant 0 : i32
    return %arg0, %c0_i32, %c0_i32_0, %arg1 : i32, i32, i32, i32
  }
  func.func @transform_9(%arg0: i32, %arg1: i32) -> (i32, i32, i32, i32) {
    %c0_i32 = arith.constant 0 : i32
    %c0_i32_0 = arith.constant 0 : i32
    %c0_i32_1 = arith.constant 0 : i32
    return %arg0, %c0_i32, %c0_i32_0, %arg1 : i32, i32, i32, i32
  }
  func.func @transform_10(%arg0: i32, %arg1: i32) -> (i32, i32, i32, i32) {
    %c0_i32 = arith.constant 0 : i32
    %c0_i32_0 = arith.constant 0 : i32
    %c0_i32_1 = arith.constant 0 : i32
    return %arg0, %c0_i32, %c0_i32_0, %arg1 : i32, i32, i32, i32
  }
  func.func @transform_11(%arg0: i32, %arg1: i32) -> (i32, i32, i32, i32) {
    %c0_i32 = arith.constant 0 : i32
    %c0_i32_0 = arith.constant 0 : i32
    %c0_i32_1 = arith.constant 0 : i32
    return %arg0, %c0_i32, %c0_i32_0, %arg1 : i32, i32, i32, i32
  }
  func.func @transform_12(%arg0: i32, %arg1: i32) -> (i32, i32, i32, i32) {
    %c0_i32 = arith.constant 0 : i32
    %c0_i32_0 = arith.constant 0 : i32
    %c0_i32_1 = arith.constant 0 : i32
    return %arg0, %c0_i32, %c0_i32_0, %arg1 : i32, i32, i32, i32
  }
}

</mosaic_0001>

<bundles_post_ra>
// kernel: tpu_custom_call.1
= control target key start
LH: loop header
LB: loop body
LE: loop exit
PB: predicated region body
PF: predicated region fallthrough
CT: control target
= control target key end

     0   :  { %s2795_s0 = inlined_call_operand.<no memory space> [shape: f32[1,1], index: 0, kind: input, shape index: {}]   ;;  %s2796_s1 = inlined_call_operand.vmem [shape: f32[2,8,4,1], index: 1, kind: input, shape index: {}]   ;;  %s2797_s2 = inlined_call_operand.vmem [shape: f32[2,8,4,1], index: 2, kind: input, shape index: {}]   ;;  %s2798_s3 = inlined_call_operand.vmem [shape: f32[2,8,4,1], index: 3, kind: input, shape index: {}]   ;;  %s2799_s4 = inlined_call_operand.vmem [shape: f32[2,8,4,1], index: 4, kind: input, shape index: {}]   ;;  %s2800_s5 = inlined_call_operand.vmem [shape: f32[2,8,4,256], index: 5, kind: input, shape index: {}]   ;;  %s2801_s6 = inlined_call_operand.vmem [shape: f32[2,8,4,256], index: 6, kind: input, shape index: {}]   ;;  %s2802_s7 = inlined_call_operand.hbm [shape: f32[2,8,4,256], index: 7, kind: output, shape index: {0}]   ;;  %s2803_s8 = inlined_call_operand.hbm [shape: f32[2,8,4,256], index: 8, kind: output, shape index: {1}]   ;;  %s2804_s9 = inlined_call_operand.hbm [shape: f32[2,8,4,256], index: 9, kind: output, shape index: {2}]   ;;  %s2805_s10 = inlined_call_operand.hbm [shape: f32[2,8,4,256], index: 10, kind: output, shape index: {3}]   ;;  %s2806_s11 = inlined_call_operand.hbm [shape: f32[2,1,4,256], index: 11, kind: output, shape index: {4}]   ;;  %s2807_s12 = inlined_call_operand.hbm [shape: f32[2,1,4,256], index: 12, kind: output, shape index: {5}]  }
   0x1   :  { %2814 = sst [smem:[#allocation19_spill]] %s2796_s1 }
   0x2   :  { %2815 = sst [smem:[#allocation20_spill]] %s2797_s2 }
   0x3   :  { %2816 = sst [smem:[#allocation21_spill]] %s2798_s3 }
   0x4   :  { %2817 = sst [smem:[#allocation22_spill]] %s2799_s4 }
   0x5   :  { %2818 = sst [smem:[#allocation23_spill]] %s2800_s5 }
   0x6   :  { %2819 = sst [smem:[#allocation24_spill]] %s2801_s6 }
   0x7   :  { %2820 = sst [smem:[#allocation25_spill]] %s2803_s8 }
   0x8   :  { %18 = sst [smem:[#allocation2]] %s2795_s0 }
   0x9   :  { %19 = vsyncpa [#allocation4], 0 }
   0xa   :  { %21 = vsyncpa [#allocation4 + $0x1], 0 }
   0xb   :  { %22 = vsyncpa [#allocation6], 0 }
   0xc   :  { %24 = vsyncpa [#allocation6 + $0x1], 0 }
   0xd   :  { %25 = vsyncpa [#allocation9], 0 }
   0xe   :  { %27 = vsyncpa [#allocation9 + $0x1], 0 }
   0xf   :  { %28 = vsyncpa [#allocation12], 0 }
  0x10   :  { %30 = vsyncpa [#allocation12 + $0x1], 0  ;;  %s2213_s23 = smov 0   ;;  %s2215_s24 = smov 0  }
  0x11   :  { %s2217_s25 = smov 0   ;;  %s2219_s26 = smov 0  }
  0x12   :  { %s2221_s27 = smov 0   ;;  %s2223_s28 = smov 0  }
  0x13 LB: > { %2821 = sst [smem:[#allocation17_spill]] %s2129_s27  ;;  %s2809_s0 = sadd.s32 4294967295, %s2133_s28   ;;  %s2133_s28 = sphi %s2223_s28, %s36_s28   ;;  %s2129_s27 = sphi %s2221_s27, %s2839_s27   ;;  %s2125_s26 = sphi %s2219_s26, %s2838_s26   ;;  %s2121_s25 = sphi %s2217_s25, %s2842_s25   ;;  %s2117_s24 = sphi %s2215_s24, %s2841_s24   ;;  %s2113_s23 = sphi %s2213_s23, %s2840_s23  }
  0x14   : > { %s2808_s29 = sadd.s32 4294967294, %s2133_s28   ;;  %s48_s30 = sadd.s32 1, %s2129_s27 }
  0x15   : > { %s238_s13 = sadd.s32 1, %s2121_s25  ;;  %p50_p0 = scmp.ge.s32.totalorder %s48_s30, 2 }
  0x16   : > { %p248_p1 = scmp.ne.s32.totalorder %s2121_s25, %s2117_s24  ;;  %p249_p2 = scmp.eq.s32.totalorder %s2809_s0, 1 }
  0x17   : > { %p254_p3 = scmp.ne.s32.totalorder %s2117_s24, %s2113_s23  ;;  %s2844_s30 = smov (%p50_p0, %s48_s30), 0 }
  0x18   : > { %2822 = sst [smem:[#allocation18_spill]] %s2844_s30  ;;  %p2255_p4 = por %p249_p2, %p248_p1 }
  0x19   : > { %p255_p5 = scmp.eq.s32.totalorder %s2808_s29, 1  ;;  %s233_s15 = ssub.s32 %s2129_s27, %s2844_s30 }
  0x1a   : > { %p1766_p6 = scmp.ge.s32.totalorder %s2133_s28, 1  ;;  %p236_p7 = scmp.eq.s32.totalorder %s233_s15, 0 }
  0x1b   : > { %p2264_p8 = por %p255_p5, %p254_p3  ;;  %p474_p9 = scmp.lt.s32.totalorder %s2133_s28, 3 }
  0x1c   : > { %s2270_s17 = scalar_select %p236_p7, %s2121_s25, %s238_s13  }
  0x1d   : > { %p475_p10 = pnand %p1766_p6, %p474_p9 }
  0x1e   : > { %p574_p11 = scmp.lt.s32.totalorder (!%p475_p10), %s2125_s26, 1  ;;  %v2135_v0 = vmov (!%p475_p10), 0   ;;  %s2825_s1 = sld [smem:[#allocation19_spill]] (!%p475_p10) }
  0x1f   : > { %478 = sbr.rel (%p475_p10) target bundleno = 302 (0x12e), region = 48  ;;  %1902 = vset.pattern.permute.xlu1 (!%p475_p10), %v2135_v0  ;;  %1901 = vset.pattern.permute.xlu0 (!%p475_p10), %v2135_v0  ;;  %s2826_s5 = sld [smem:[#allocation23_spill]] (!%p475_p10) }
  0x20   : > { %s2827_s2 = sld [smem:[#allocation20_spill]] (!%p475_p10)  ;;  %s2299_s30 = sand.u32 (!%p475_p10), 1, %s2117_s24  }
  0x21   : > { %s2304_s29 = sshll.u32 (!%p475_p10), %s2299_s30, 6  ;;  %s2828_s4 = sld [smem:[#allocation22_spill]] (!%p475_p10) }
  0x22   : > { %s2829_s6 = sld [smem:[#allocation24_spill]] (!%p475_p10)  ;;  %s2830_s3 = sld [smem:[#allocation21_spill]] (!%p475_p10) }
  0x23   : > { %s2832_s8 = sld [smem:[#allocation25_spill]] (!%p475_p10) }
  0x26   : > { %s2274_s18 = scalar_select %p574_p11, %s2125_s26, 1 }
  0x28   : > { %s2277_s19 = sshll.u32 %s2274_s18, 5  ;;  %s1809_s13 = sshll.u32 %s2274_s18, 6 }
  0x29   : > { %s578_s22 = scalar_lea.vmem %s2825_s1, %s2277_s19  ;;  %s2289_s0 = scalar_lea.vmem %s2826_s5, %s1809_s13 }
  0x2a   : > { %v679_v1 = vld [vmem:[%s578_s22 + $0x8] sm:$0xf]  ;;  %v677_v2 = vld [vmem:[%s578_s22] sm:$0xf]  ;;  %v680_v3 = vld [vmem:[%s578_s22 + $0xc] sm:$0xf]  ;;  %s2295_s1 = scalar_lea.vmem %s2827_s2, %s2277_s19  ;;  %s2314_s20 = scalar_lea.vmem %s2828_s4, %s2277_s19 }
  0x2b   : > { %703 = vperm.xlu1 %1902, %v679_v1   ;;  %695 = vperm.xlu0 %1901, %v677_v2   ;;  %v678_v4 = vld [vmem:[%s578_s22 + $0x4] sm:$0xf]  ;;  %v682_v5 = vld [vmem:[%s578_s22 + $0x14] sm:$0xf]  ;;  %v681_v6 = vld [vmem:[%s578_s22 + $0x10] sm:$0xf]  ;;  %s2325_s5 = scalar_lea.vmem %s2829_s6, %s1809_s13  ;;  %s588_s13 = scalar_lea.vmem %s2830_s3, %s2277_s19 }
  0x2c   : > { %v684_v7 = vld [vmem:[%s578_s22 + $0x1c] sm:$0xf]  ;;  %v683_v8 = vld [vmem:[%s578_s22 + $0x18] sm:$0xf]  ;;  %v623_v9 = vld [vmem:[%s2289_s0 + $0x10] sm:$0xff]  ;;  %s2330_s22 = scalar_lea.vmem [#allocation3], %s2304_s29 }
  0x2d   : > { %vm631_vm0 = vcmp.le.f32.partialorder %v623_v9, 0.5  ;;  %v639_v10 = vsub.f32 0.0, %v623_v9  ;;  %v647_v11 = vsub.f32 1.0, %v623_v9  ;;  %v621_v12 = vld [vmem:[%s2289_s0] sm:$0xff]  ;;  %v624_v16 = vld [vmem:[%s2289_s0 + $0x18] sm:$0xff]  ;;  %v622_v20 = vld [vmem:[%s2289_s0 + $0x8] sm:$0xff] }
  0x2e   : > { %v686_v13 = vld [vmem:[%s2295_s1 + $0x4] sm:$0xf]  ;;  %vm629_vm1 = vcmp.le.f32.partialorder %v621_v12, 0.5  ;;  %v637_v14 = vsub.f32 0.0, %v621_v12  ;;  %v645_v15 = vsub.f32 1.0, %v621_v12  ;;  %vm632_vm2 = vcmp.le.f32.partialorder %v624_v16, 0.5 }
  0x2f   : > { %707 = vperm.xlu1 %1902, %v680_v3   ;;  %699 = vperm.xlu0 %1901, %v678_v4   ;;  %v655_v17 = vsel %vm631_vm0, %v639_v10, %v647_v11  ;;  %v640_v18 = vsub.f32 0.0, %v624_v16  ;;  %v648_v19 = vsub.f32 1.0, %v624_v16  ;;  %v626_v21 = vld [vmem:[%s2289_s0 + $0x28] sm:$0xff]  ;;  %v685_v22 = vld [vmem:[%s2295_s1] sm:$0xf]  ;;  %vm630_vm3 = vcmp.le.f32.partialorder %v622_v20, 0.5 }
  0x30   : > { %v2316_v23 = vadd.f32 %v655_v17, %v623_v9  ;;  %v653_v24 = vsel %vm629_vm1, %v637_v14, %v645_v15  ;;  %v638_v25 = vsub.f32 0.0, %v622_v20  ;;  %v625_v26 = vld [vmem:[%s2289_s0 + $0x20] sm:$0xff]  ;;  %v628_v27 = vld [vmem:[%s2289_s0 + $0x38] sm:$0xff]  ;;  %v646_v30 = vsub.f32 1.0, %v622_v20  ;;  %v627_v34 = vld [vmem:[%s2289_s0 + $0x30] sm:$0xff]  ;;  %s2379_s2 = scalar_lea.vmem [#allocation5], %s2304_s29 }
  0x31   : > { %v2327_v28 = vadd.f32 %v653_v24, %v621_v12  ;;  %v656_v29 = vsel %vm632_vm2, %v640_v18, %v648_v19  ;;  %vm634_vm4 = vcmp.le.f32.partialorder %v626_v21, 0.5  ;;  %v642_v32 = vsub.f32 0.0, %v626_v21  ;;  %v1037_v35 = vld [vmem:[%s2314_s20 + $0x4] sm:$0xf]  ;;  %v1036_v39 = vld [vmem:[%s2314_s20] sm:$0xf] }
  0x32   : > { %671 = vst [vmem:[%s2330_s22 + $0x10] sm:$0xff] %v2316_v23  ;;  %v2334_v31 = vadd.f32 %v656_v29, %v624_v16  ;;  %v650_v33 = vsub.f32 1.0, %v626_v21  ;;  %vm633_vm5 = vcmp.le.f32.partialorder %v625_v26, 0.5  ;;  %v654_v36 = vsel %vm630_vm3, %v638_v25, %v646_v30  ;;  %v973_v44 = vld [vmem:[%s2325_s5 + $0x8] sm:$0xff]  ;;  %v972_v48 = vld [vmem:[%s2325_s5] sm:$0xff]  ;;  %v974_v60 = vld [vmem:[%s2325_s5 + $0x10] sm:$0xff] }
  0x33   : > { %715 = vperm.xlu1 %1902, %v682_v5   ;;  %711 = vperm.xlu0 %1901, %v681_v6   ;;  %669 = vst [vmem:[%s2330_s22] sm:$0xff] %v2327_v28  ;;  %v641_v37 = vsub.f32 0.0, %v625_v26  ;;  %v649_v38 = vsub.f32 1.0, %v625_v26  ;;  %vm636_vm6 = vcmp.le.f32.partialorder %v628_v27, 0.5  ;;  %v2344_v40 = vadd.f32 %v654_v36, %v622_v20  ;;  %v1038_v52 = vld [vmem:[%s2314_s20 + $0x8] sm:$0xf]  ;;  %v976_v15 = vld [vmem:[%s2325_s5 + $0x20] sm:$0xff] }
  0x34   : > { %672 = vst [vmem:[%s2330_s22 + $0x18] sm:$0xff] %v2334_v31  ;;  %v658_v41 = vsel %vm634_vm4, %v642_v32, %v650_v33  ;;  %v644_v42 = vsub.f32 0.0, %v628_v27  ;;  %v652_v43 = vsub.f32 1.0, %v628_v27  ;;  %vm635_vm7 = vcmp.le.f32.partialorder %v627_v34, 0.5  ;;  %v687_v56 = vld [vmem:[%s2295_s1 + $0x8] sm:$0xf] }
  0x35   : > { %v2348_v45 = vadd.f32 %v658_v41, %v626_v21  ;;  %v657_v46 = vsel %vm633_vm5, %v641_v37, %v649_v38  ;;  %v643_v47 = vsub.f32 0.0, %v627_v34  ;;  %670 = vst [vmem:[%s2330_s22 + $0x8] sm:$0xff] %v2344_v40  ;;  %v651_v51 = vsub.f32 1.0, %v627_v34  ;;  %v1039_v5 = vld [vmem:[%s2314_s20 + $0xc] sm:$0xf]  ;;  %v978_v32 = vld [vmem:[%s2325_s5 + $0x30] sm:$0xff] }
  0x36   : > { %v2354_v49 = vadd.f32 %v657_v46, %v625_v26  ;;  %v660_v50 = vsel %vm636_vm6, %v644_v42, %v652_v43  ;;  %vm981_vm8 = vcmp.le.f32.partialorder %v973_v44, 0.5  ;;  %v989_v54 = vsub.f32 0.0, %v973_v44  ;;  %v688_v6 = vld [vmem:[%s2295_s1 + $0xc] sm:$0xf]  ;;  %v1040_v12 = vld [vmem:[%s2314_s20 + $0x10] sm:$0xf] }
  0x37   : > { %723 = vperm.xlu1 %1902, %v684_v7   ;;  %719 = vperm.xlu0 %1901, %v683_v8   ;;  %674 = vst [vmem:[%s2330_s22 + $0x28] sm:$0xff] %v2348_v45  ;;  %v2359_v53 = vadd.f32 %v660_v50, %v628_v27  ;;  %v997_v55 = vsub.f32 1.0, %v973_v44  ;;  %v659_v57 = vsel %vm635_vm7, %v643_v47, %v651_v51  ;;  %vm980_vm9 = vcmp.le.f32.partialorder %v972_v48, 0.5  ;;  %v975_v8 = vld [vmem:[%s2325_s5 + $0x18] sm:$0xff]  ;;  %v1041_v19 = vld [vmem:[%s2314_s20 + $0x14] sm:$0xf] }
  0x38   : > { %673 = vst [vmem:[%s2330_s22 + $0x20] sm:$0xff] %v2354_v49  ;;  %v988_v58 = vsub.f32 0.0, %v972_v48  ;;  %v996_v59 = vsub.f32 1.0, %v972_v48  ;;  %v2368_v61 = vadd.f32 %v659_v57, %v627_v34  ;;  %v990_v63 = vsub.f32 0.0, %v974_v60  ;;  %v690_v20 = vld [vmem:[%s2295_s1 + $0x14] sm:$0xf] }
  0x39   : > { %676 = vst [vmem:[%s2330_s22 + $0x38] sm:$0xff] %v2359_v53  ;;  %v1005_v62 = vsel %vm981_vm8, %v989_v54, %v997_v55  ;;  %v998_v0 = vsub.f32 1.0, %v974_v60  ;;  %vm982_vm10 = vcmp.le.f32.partialorder %v974_v60, 0.5  ;;  %v991_v9 = vsub.f32 0.0, %v975_v8  ;;  %v1042_v27 = vld [vmem:[%s2314_s20 + $0x18] sm:$0xf] }
  0x3a   : > { %v2370_v1 = vadd.f32 %v1005_v62, %v973_v44  ;;  %v1004_v2 = vsel %vm980_vm9, %v988_v58, %v996_v59  ;;  %675 = vst [vmem:[%s2330_s22 + $0x30] sm:$0xff] %v2368_v61  ;;  %v999_v10 = vsub.f32 1.0, %v975_v8  ;;  %vm983_vm11 = vcmp.le.f32.partialorder %v975_v8, 0.5  ;;  %v691_v29 = vld [vmem:[%s2295_s1 + $0x18] sm:$0xf]  ;;  %s2431_s19 = sshll.u32 %s2125_s26, 10 }
  0x3b   : > { %811 = vperm.xlu1 %1902, %v686_v13   ;;  %807 = vperm.xlu0 %1901, %v685_v22   ;;  %v2374_v3 = vadd.f32 %v1004_v2, %v972_v48  ;;  %v1006_v4 = vsel %vm982_vm10, %v990_v63, %v998_v0  ;;  %v689_v13 = vld [vmem:[%s2295_s1 + $0x10] sm:$0xf]  ;;  %v992_v16 = vsub.f32 0.0, %v976_v15  ;;  %v1000_v17 = vsub.f32 1.0, %v976_v15  ;;  %v977_v22 = vld [vmem:[%s2325_s5 + $0x28] sm:$0xff]  ;;  %s2437_s21 = scalar_lea.hbm %s2832_s8, %s2431_s19  ;;  %s1380_s0 = sshll.u32 %s2379_s2, 4  ;;  %s2440_s0 = int_to_ptr.vmem [resolvable:$true] %s1380_s0 }
  0x3c   : > { %1021 = vst [vmem:[%s2379_s2 + $0x8] sm:$0xff] %v2370_v1  ;;  %v2383_v7 = vadd.f32 %v1006_v4, %v974_v60  ;;  %v1007_v11 = vsel %vm983_vm11, %v991_v9, %v999_v10  ;;  %vm984_vm12 = vcmp.le.f32.partialorder %v976_v15, 0.5  ;;  %v993_v24 = vsub.f32 0.0, %v977_v22  ;;  %v692_v36 = vld [vmem:[%s2295_s1 + $0x1c] sm:$0xf]  ;;  %s2831_s1 = sadd.s32 4294967295, %s2133_s28  }
  0x3d   : > { %1020 = vst [vmem:[%s2379_s2] sm:$0xff] %v2374_v3  ;;  %v2392_v14 = vadd.f32 %v1007_v11, %v975_v8  ;;  %v1008_v18 = vsel %vm984_vm12, %v992_v16, %v1000_v17  ;;  %v1001_v25 = vsub.f32 1.0, %v977_v22  ;;  %vm985_vm13 = vcmp.le.f32.partialorder %v977_v22, 0.5  ;;  %v1029_v43 = vld [vmem:[%s588_s13 + $0x4] sm:$0xf]  ;;  %v1028_v44 = vld [vmem:[%s588_s13] sm:$0xf] }
  0x3e   : > { %1022 = vst [vmem:[%s2379_s2 + $0x10] sm:$0xff] %v2383_v7  ;;  %v2399_v21 = vadd.f32 %v1008_v18, %v976_v15  ;;  %v994_v33 = vsub.f32 0.0, %v978_v32  ;;  %v1002_v34 = vsub.f32 1.0, %v978_v32  ;;  %vm986_vm14 = vcmp.le.f32.partialorder %v978_v32, 0.5  ;;  %v1031_v48 = vld [vmem:[%s588_s13 + $0xc] sm:$0xf] }
  0x3f   : > { %1162 = vperm.xlu1 %1902, %v1037_v35   ;;  %1158 = vperm.xlu0 %1901, %v1036_v39   ;;  %1023 = vst [vmem:[%s2379_s2 + $0x18] sm:$0xff] %v2392_v14  ;;  %v1009_v26 = vsel %vm985_vm13, %v993_v24, %v1001_v25  ;;  %v1043_v35 = vld [vmem:[%s2314_s20 + $0x1c] sm:$0xf]  ;;  %v1030_v50 = vld [vmem:[%s588_s13 + $0x8] sm:$0xf] }
  0x40   : > { %1024 = vst [vmem:[%s2379_s2 + $0x20] sm:$0xff] %v2399_v21  ;;  %v2406_v30 = vadd.f32 %v1009_v26, %v977_v22  ;;  %v1010_v37 = vsel %vm986_vm14, %v994_v33, %v1002_v34  ;;  %v979_v39 = vld [vmem:[%s2325_s5 + $0x38] sm:$0xff]  ;;  %v1033_v51 = vld [vmem:[%s588_s13 + $0x14] sm:$0xf]  ;;  %s2428_s5 = sand.u32 1, %s2831_s1   ;;  %s2136_s1 = smov [#allocation5]  }
  0x41   : > { %v2417_v38 = vadd.f32 %v1010_v37, %v978_v32  ;;  %v995_v41 = vsub.f32 0.0, %v979_v39  ;;  %v1003_v42 = vsub.f32 1.0, %v979_v39  ;;  %vm987_vm15 = vcmp.le.f32.partialorder %v979_v39, 0.5  ;;  %v1035_v54 = vld [vmem:[%s588_s13 + $0x1c] sm:$0xf]  ;;  %s1907_s3 = sshll.u32 %s2136_s1, 4  ;;  %s1908_s3 = int_to_ptr.vmem [resolvable:$false] %s1907_s3 }
  0x42   : > { %1025 = vst [vmem:[%s2379_s2 + $0x28] sm:$0xff] %v2406_v30  ;;  %v1034_v55 = vld [vmem:[%s588_s13 + $0x18] sm:$0xf]  ;;  %s1909_s4 = scalar_lea.vmem %s1908_s3, 2048  ;;  %p1910_p1 = scmp.lt.s32.totalorder %s2440_s0, %s1908_s3 }
  0x43   : > { %1166 = vperm.xlu1 %1902, %v1038_v52   ;;  %815 = vperm.xlu0 %1901, %v687_v56   ;;  %1026 = vst [vmem:[%s2379_s2 + $0x30] sm:$0xff] %v2417_v38  ;;  %v1011_v46 = vsel %vm987_vm15, %v995_v41, %v1003_v42  ;;  %v1032_v52 = vld [vmem:[%s588_s13 + $0x10] sm:$0xf]  ;;  %s1903_s13 = scalar_lea.vmem %s2440_s0, 1024 }
  0x44   : > { %v2422_v47 = vadd.f32 %v1011_v46, %v979_v39  ;;  %p1904_p12 = scmp.ne.s32.totalorder %s2440_s0, %s1903_s13  ;;  %p1911_p2 = scmp.lt.s32.totalorder %s1909_s4, %s1903_s13 }
  0x46   : > { %1027 = vst [vmem:[%s2379_s2 + $0x38] sm:$0xff] %v2422_v47  ;;  %p1905_p13 = pnand %p1904_p12, %p2255_p4  ;;  %p1912_p3 = por %p1911_p2, %p1910_p1 }
  0x47   : > { %1170 = vperm.xlu1 %1902, %v1039_v5   ;;  %819 = vperm.xlu0 %1901, %v688_v6  }
  0x48   : > { %p1906_p0 = pneg %p1905_p13 }
  0x4a   : > { %p1913_p5 = pnand %p1912_p3, %p1906_p0 }
  0x4b   : > { %1174 = vperm.xlu1 %1902, %v1040_v12   ;;  %823 = vperm.xlu0 %1901, %v689_v13  }
  0x4f   : > { %1178 = vperm.xlu1 %1902, %v1041_v19   ;;  %827 = vperm.xlu0 %1901, %v690_v20  }
  0x53   : > { %1182 = vperm.xlu1 %1902, %v1042_v27   ;;  %831 = vperm.xlu0 %1901, %v691_v29  }
  0x57   : > { %1186 = vperm.xlu1 %1902, %v1043_v35   ;;  %835 = vperm.xlu0 %1901, %v692_v36  }
  0x5b   : > { %1050 = vperm.xlu1 %1902, %v1029_v43   ;;  %1046 = vperm.xlu0 %1901, %v1028_v44  }
  0x5f   : > { %1058 = vperm.xlu1 %1902, %v1031_v48   ;;  %1054 = vperm.xlu0 %1901, %v1030_v50  }
  0x63   : > { %1066 = vperm.xlu1 %1902, %v1033_v51   ;;  %1062 = vperm.xlu0 %1901, %v1032_v52  }
  0x67   : > { %1074 = vperm.xlu1 %1902, %v1035_v54   ;;  %1070 = vperm.xlu0 %1901, %v1034_v55  }
  0x68   : > { %1916 = shalt.err (!%p1913_p5)
}
  0x69   : > { %s1917_s2 = scalar_lea.hbm %s2437_s21, 1024  ;;  %s1921_s1 = scalar_lea.hbm %s2832_s8, 2048 }
  0x6a   : > { %p1918_p6 = scmp.ne.s32.totalorder %s2437_s21, %s1917_s2  ;;  %p1922_p10 = scmp.lt.u32.totalorder %s2437_s21, %s2832_s8 }
  0x6b   : > { %p1923_p11 = scmp.lt.u32.totalorder %s1921_s1, %s1917_s2  ;;  %p1925_p13 = scmp.lt.u32.totalorder %s1917_s2, %s2437_s21 }
  0x6c   : > { %p1919_p7 = pnand %p1918_p6, %p2255_p4 }
  0x6d   : > { %p1924_p12 = por %p1923_p11, %p1922_p10 }
  0x6e   : > { %p1920_p9 = pneg %p1919_p7 }
  0x6f   : > { %p1926_p0 = por %p1925_p13, %p1924_p12 }
  0x71   : > { %p1927_p1 = pnand %p1926_p0, %p1920_p9 }
  0x73   : > { %1930 = shalt.err (!%p1927_p1)
}
  0x74   : > { %s2812_s4 = smov 128   ;;  %s2813_s13 = smov 8  }
  0x75   : > { %s2833_s18 = scalar_lea.sflag [#allocation6], %s2428_s5  ;;  %s2473_s20 = scalar_lea.hbm %s2802_s7, %s2431_s19 }
  0x76   : > { %1818 = dma.vmem_to_hbm [thread:$0]  (%p2255_p4), %s2440_s0, 1024, %s2437_s21, %s2833_s18, %s2812_s4, %s2812_s4, %s2813_s13  }
  0x77   : > { %s1362_s1 = sshll.u32 %s2330_s22, 4  ;;  %s1322_s3 = scalar_lea.sflag [#allocation4], %s2299_s30  ;;  %s2476_s1 = int_to_ptr.vmem [resolvable:$true] %s1362_s1 }
  0x78   : > { %s1931_s6 = scalar_lea.vmem %s2476_s1, 1024  ;;  %s2139_s8 = smov [#allocation3]  }
  0x79   : > { %p1932_p2 = scmp.ne.s32.totalorder %s2476_s1, %s1931_s6  ;;  %s1935_s27 = sshll.u32 %s2139_s8, 4  ;;  %s1936_s27 = int_to_ptr.vmem [resolvable:$false] %s1935_s27 }
  0x7a   : > { %s1937_s21 = scalar_lea.vmem %s1936_s27, 2048  ;;  %p1938_p6 = scmp.lt.s32.totalorder %s2476_s1, %s1936_s27 }
  0x7b   : > { %p1933_p3 = pnand %p1932_p2, %p2255_p4  ;;  %p1939_p7 = scmp.lt.s32.totalorder %s1937_s21, %s1931_s6 }
  0x7d   : > { %p1934_p5 = pneg %p1933_p3  ;;  %p1940_p9 = por %p1939_p7, %p1938_p6 }
  0x7f   : > { %p1941_p10 = pnand %p1940_p9, %p1934_p5 }
  0x81   : > { %1944 = shalt.err (!%p1941_p10)
}
  0x82   : > { %s1945_s22 = scalar_lea.hbm %s2473_s20, 1024  ;;  %s1949_s8 = scalar_lea.hbm %s2802_s7, 2048 }
  0x83   : > { %p1946_p11 = scmp.ne.s32.totalorder %s2473_s20, %s1945_s22  ;;  %p1950_p0 = scmp.lt.u32.totalorder %s2473_s20, %s2802_s7 }
  0x84   : > { %p1951_p1 = scmp.lt.u32.totalorder %s1949_s8, %s1945_s22  ;;  %p1953_p3 = scmp.lt.u32.totalorder %s1945_s22, %s2473_s20 }
  0x85   : > { %p1947_p12 = pnand %p1946_p11, %p2255_p4 }
  0x86   : > { %p1952_p2 = por %p1951_p1, %p1950_p0 }
  0x87   : > { %p1948_p13 = pneg %p1947_p12 }
  0x88   : > { %p1954_p5 = por %p1953_p3, %p1952_p2 }
  0x8a   : > { %p1955_p6 = pnand %p1954_p5, %p1948_p13 }
  0x8c   : > { %1958 = shalt.err (!%p1955_p6)
}
  0x8d   : > { %1817 = dma.vmem_to_hbm [thread:$0]  (%p2255_p4), %s2476_s1, 1024, %s2473_s20, %s1322_s3, %s2812_s4, %s2812_s4, %s2813_s13   ;;  %v2140_v56 = vmov 839922192   ;;  %v728_v58 = vlaneseq }
  0x8e   : > { %v726_v57 = vunpack.c.l.s4 %v2140_v56  ;;  %s552_s6 = scalar_lea.vmem [#allocation7], %s2304_s29  ;;  %s2530_s3 = scalar_lea.hbm %s2804_s9, %s2431_s19 }
  0x8f   : > { %v729_v60 = vshrl.u32 %v728_v58, 7  ;;  %s1398_s15 = sshll.u32 %s552_s6, 4  ;;  %s2141_s22 = smov [#allocation7]   ;;  %s2522_s15 = int_to_ptr.vmem [resolvable:$true] %s1398_s15 }
  0x90   : > { %v727_v59 = vunpack.c.0.s8 %v726_v57  ;;  %s1959_s21 = scalar_lea.vmem %s2522_s15, 1024  ;;  %s1963_s0 = sshll.u32 %s2141_s22, 4  ;;  %s1964_s0 = int_to_ptr.vmem [resolvable:$false] %s1963_s0 }
  0x91   : > { %p1960_p7 = scmp.ne.s32.totalorder %s2522_s15, %s1959_s21  ;;  %s1965_s18 = scalar_lea.vmem %s1964_s0, 2048 }
  0x92   : > { %v2505_v62 = vsub.s32 %v727_v59, %v729_v60  ;;  %p1966_p11 = scmp.lt.s32.totalorder %s2522_s15, %s1964_s0  ;;  %p1967_p12 = scmp.lt.s32.totalorder %s1965_s18, %s1959_s21 }
  0x93   : > { %p1961_p9 = pnand %p1960_p7, %p2255_p4 }
  0x94   : > { %p1968_p13 = por %p1967_p12, %p1966_p11 }
  0x95   : > { %p1962_p10 = pneg %p1961_p9 }
  0x97   : > { %p1969_p0 = pnand %p1968_p13, %p1962_p10 }
  0xaa   : > { %v704_v63 = vpop.permute.xlu1 %703  ;;  %v696_v0 = vpop.permute.xlu0 %695 }
  0xab   : > { %v745_v2 = vrot.slane %v704_v63, %v2505_v62  ;;  %v731_v4 = vrot.slane %v696_v0, %v2505_v62 }
  0xad   : > { %v791_v5 = vmul.f32 %v745_v2, %v2316_v23  ;;  %v789_v6 = vmul.f32 %v731_v4, %v2327_v28 }
  0xae   : > { %v708_v8 = vpop.permute.xlu1 %707  ;;  %v700_v9 = vpop.permute.xlu0 %699 }
  0xaf   : > { %799 = vst [vmem:[%s552_s6 + $0x10] sm:$0xff] %v791_v5  ;;  %797 = vst [vmem:[%s552_s6] sm:$0xff] %v789_v6  ;;  %v752_v10 = vrot.slane %v708_v8, %v2505_v62  ;;  %v738_v11 = vrot.slane %v700_v9, %v2505_v62 }
  0xb1   : > { %v792_v12 = vmul.f32 %v752_v10, %v2334_v31  ;;  %v790_v13 = vmul.f32 %v738_v11, %v2344_v40 }
  0xb2   : > { %v716_v15 = vpop.permute.xlu1 %715  ;;  %v712_v16 = vpop.permute.xlu0 %711 }
  0xb3   : > { %800 = vst [vmem:[%s552_s6 + $0x18] sm:$0xff] %v792_v12  ;;  %798 = vst [vmem:[%s552_s6 + $0x8] sm:$0xff] %v790_v13  ;;  %v766_v17 = vrot.slane %v716_v15, %v2505_v62  ;;  %v759_v18 = vrot.slane %v712_v16, %v2505_v62 }
  0xb5   : > { %v794_v19 = vmul.f32 %v766_v17, %v2348_v45  ;;  %v793_v20 = vmul.f32 %v759_v18, %v2354_v49 }
  0xb6   : > { %v724_v22 = vpop.permute.xlu1 %723  ;;  %v720_v24 = vpop.permute.xlu0 %719 }
  0xb7   : > { %802 = vst [vmem:[%s552_s6 + $0x28] sm:$0xff] %v794_v19  ;;  %801 = vst [vmem:[%s552_s6 + $0x20] sm:$0xff] %v793_v20  ;;  %v780_v25 = vrot.slane %v724_v22, %v2505_v62  ;;  %v773_v26 = vrot.slane %v720_v24, %v2505_v62 }
  0xb9   : > { %v796_v27 = vmul.f32 %v780_v25, %v2359_v53  ;;  %v795_v29 = vmul.f32 %v773_v26, %v2368_v61 }
  0xba   : > { %v812_v32 = vpop.permute.xlu1 %811  ;;  %v808_v33 = vpop.permute.xlu0 %807 }
  0xbb   : > { %804 = vst [vmem:[%s552_s6 + $0x38] sm:$0xff] %v796_v27  ;;  %803 = vst [vmem:[%s552_s6 + $0x30] sm:$0xff] %v795_v29 }
  0xbc   : > { %1972 = shalt.err (!%p1969_p0)
}
  0xbd   : > { %s1973_s8 = scalar_lea.hbm %s2530_s3, 1024  ;;  %s1977_s6 = scalar_lea.hbm %s2804_s9, 2048 }
  0xbe   : > { %p1974_p1 = scmp.ne.s32.totalorder %s2530_s3, %s1973_s8  ;;  %p1978_p5 = scmp.lt.u32.totalorder %s2530_s3, %s2804_s9 }
  0xbf   : > { %p1979_p6 = scmp.lt.u32.totalorder %s1977_s6, %s1973_s8  ;;  %p1981_p9 = scmp.lt.u32.totalorder %s1973_s8, %s2530_s3 }
  0xc0   : > { %p1975_p2 = pnand %p1974_p1, %p2255_p4 }
  0xc1   : > { %p1980_p7 = por %p1979_p6, %p1978_p5 }
  0xc2   : > { %p1976_p3 = pneg %p1975_p2 }
  0xc3   : > { %p1982_p10 = por %p1981_p9, %p1980_p7 }
  0xc5   : > { %p1983_p11 = pnand %p1982_p10, %p1976_p3 }
  0xc7   : > { %1986 = shalt.err (!%p1983_p11)
}
  0xc8   : > { %s2834_s21 = scalar_lea.sflag [#allocation6], %s2428_s5  ;;  %v850_v34 = vrot.slane %v812_v32, %v2505_v62  ;;  %v843_v35 = vrot.slane %v808_v33, %v2505_v62  ;;  %v1163_v36 = vpop.permute.xlu1 %1162  ;;  %v1159_v37 = vpop.permute.xlu0 %1158  ;;  %vm933_vm0 = vcmask 1043456   ;;  %s2635_s22 = scalar_lea.vmem [#allocation8], %s2304_s29 }
  0xc9   : > { %1819 = dma.vmem_to_hbm [thread:$0]  (%p2255_p4), %s2522_s15, 1024, %s2530_s3, %s2834_s21, %s2812_s4, %s2812_s4, %s2813_s13   ;;  %v1201_v39 = vrot.slane %v1163_v36, %v2505_v62  ;;  %v1194_v41 = vrot.slane %v1159_v37, %v2505_v62 }
  0xca   : > { %v902_v42 = vmul.f32 %v850_v34, %v2344_v40  ;;  %v901_v43 = vmul.f32 %v843_v35, %v2327_v28  ;;  %s2572_s15 = sld [smem:[#allocation2]]  ;;  %s1771_s3 = sshll.u32 %s2299_s30, 3 }
  0xcb   : > { %v1253_v48 = vmul.f32 %v1201_v39, %v2370_v1  ;;  %v1252_v50 = vmul.f32 %v1194_v41, %v2374_v3  ;;  %s1815_s0 = sshll.u32 %s2125_s26, 7  ;;  %s573_s18 = scalar_lea.vmem [#allocation11], %s1771_s3 }
  0xcc   : > { %v1167_v44 = vpop.permute.xlu1 %1166  ;;  %v816_v46 = vpop.permute.xlu0 %815  ;;  %v918_v54 = vcombine.high %v902_v42, %v902_v42  ;;  %v935_v40 = vsel %vm933_vm0, %v902_v42, 0.0  ;;  %v917_v57 = vcombine.high %v901_v43, %v901_v43  ;;  %v934_v28 = vsel %vm933_vm0, %v901_v43, 0.0  ;;  %s1451_s8 = sshll.u32 %s573_s18, 4  ;;  %s2657_s27 = scalar_lea.hbm %s2807_s12, %s1815_s0  ;;  %s2659_s8 = int_to_ptr.vmem [resolvable:$true] %s1451_s8 }
  0xcd   : > { %v1208_v51 = vrot.slane %v1167_v44, %v2505_v62  ;;  %v857_v52 = vrot.slane %v816_v46, %v2505_v62  ;;  %v1269_v60 = vcombine.high %v1253_v48, %v1253_v48  ;;  %v1285_v63 = vsel %vm933_vm0, %v1253_v48, 0.0  ;;  %s1416_s6 = sshll.u32 %s2635_s22, 4  ;;  %s2666_s20 = scalar_lea.vmem [#allocation10], %s1771_s3  ;;  %s2706_s6 = int_to_ptr.vmem [resolvable:$true] %s1416_s6 }
  0xce   : > { %v1268_v0 = vcombine.high %v1252_v50, %v1252_v50  ;;  %v1284_v2 = vsel %vm933_vm0, %v1252_v50, 0.0  ;;  %v950_v8 = vsel %vm933_vm0, %v918_v54, 0.0  ;;  %v936_v9 = vadd.f32 %v935_v40, %v934_v28  ;;  %s1435_s1 = sshll.u32 %s2666_s20, 4  ;;  %s1347_s21 = scalar_lea.sflag [#allocation12], %s2299_s30  ;;  %s2717_s1 = int_to_ptr.vmem [resolvable:$true] %s1435_s1 }
  0xcf   : > { %v1254_v55 = vmul.f32 %v1208_v51, %v2383_v7  ;;  %v903_v56 = vmul.f32 %v857_v52, %v2316_v23  ;;  %v949_v10 = vsel %vm933_vm0, %v917_v57, 0.0  ;;  %v1286_v11 = vadd.f32 %v1285_v63, %v1284_v2  ;;  %s2142_s3 = smov [#allocation11]  }
  0xd0   : > { %v1171_v58 = vpop.permute.xlu1 %1170  ;;  %v820_v59 = vpop.permute.xlu0 %819  ;;  %v1300_v17 = vsel %vm933_vm0, %v1269_v60, 0.0  ;;  %v1299_v18 = vsel %vm933_vm0, %v1268_v0, 0.0  ;;  %v951_v33 = vadd.f32 %v950_v8, %v949_v10  ;;  %v2593_v37 = vstv %s2572_s15  ;;  %s1987_s15 = scalar_lea.vmem %s2659_s8, 128  ;;  %s1991_s29 = sshll.u32 %s2142_s3, 4  ;;  %s1992_s29 = int_to_ptr.vmem [resolvable:$false] %s1991_s29 }
  0xd1   : > { %v1270_v4 = vcombine.high %v1254_v55, %v1254_v55  ;;  %v919_v5 = vcombine.high %v903_v56, %v903_v56  ;;  %v1215_v6 = vrot.slane %v1171_v58, %v2505_v62  ;;  %v864_v23 = vrot.slane %v820_v59, %v2505_v62  ;;  %p1988_p12 = scmp.ne.s32.totalorder %s2659_s8, %s1987_s15  ;;  %s1993_s2 = scalar_lea.vmem %s1992_s29, 256 }
  0xd2   : > { %v1287_v22 = vsel %vm933_vm0, %v1254_v55, 0.0  ;;  %v937_v25 = vsel %vm933_vm0, %v903_v56, 0.0  ;;  %v1301_v34 = vadd.f32 %v1300_v17, %v1299_v18  ;;  %p1994_p1 = scmp.lt.s32.totalorder %s2659_s8, %s1992_s29  ;;  %p1995_p2 = scmp.lt.s32.totalorder %s1993_s2, %s1987_s15 }
  0xd3   : > { %v1255_v12 = vmul.f32 %v1215_v6, %v2392_v14  ;;  %v904_v13 = vmul.f32 %v864_v23, %v2334_v31  ;;  %v1302_v24 = vsel %vm933_vm0, %v1270_v4, 0.0  ;;  %v952_v26 = vsel %vm933_vm0, %v919_v5, 0.0  ;;  %p1989_p13 = pnand %p1988_p12, %p2255_p4 }
  0xd4   : > { %v1175_v15 = vpop.permute.xlu1 %1174  ;;  %v824_v16 = vpop.permute.xlu0 %823  ;;  %v1288_v39 = vadd.f32 %v1287_v22, %v1286_v11  ;;  %v938_v41 = vadd.f32 %v937_v25, %v936_v9  ;;  %v1303_v44 = vadd.f32 %v1302_v24, %v1301_v34  ;;  %v953_v46 = vadd.f32 %v952_v26, %v951_v33  ;;  %p1996_p3 = por %p1995_p2, %p1994_p1 }
  0xd5   : > { %v1222_v19 = vrot.slane %v1175_v15, %v2505_v62  ;;  %v871_v20 = vrot.slane %v824_v16, %v2505_v62  ;;  %v1271_v31 = vcombine.high %v1255_v12, %v1255_v12  ;;  %v920_v27 = vcombine.high %v904_v13, %v904_v13  ;;  %p1990_p0 = pneg %p1989_p13 }
  0xd6   : > { %v1289_v42 = vsel %vm933_vm0, %v1255_v12, 0.0  ;;  %v939_v48 = vsel %vm933_vm0, %v904_v13, 0.0 }
  0xd7   : > { %v1256_v29 = vmul.f32 %v1222_v19, %v2399_v21  ;;  %v905_v32 = vmul.f32 %v871_v20, %v2354_v49  ;;  %v1304_v51 = vsel %vm933_vm0, %v1271_v31, 0.0  ;;  %v954_v49 = vsel %vm933_vm0, %v920_v27, 0.0  ;;  %p1997_p5 = pnand %p1996_p3, %p1990_p0 }
  0xd8   : > { %v1179_v35 = vpop.permute.xlu1 %1178  ;;  %v828_v36 = vpop.permute.xlu0 %827  ;;  %v1290_v55 = vadd.f32 %v1289_v42, %v1288_v39  ;;  %v1305_v2 = vadd.f32 %v1304_v51, %v1303_v44  ;;  %v940_v4 = vadd.f32 %v939_v48, %v938_v41  ;;  %v955_v5 = vadd.f32 %v954_v49, %v953_v46 }
  0xd9   : > { %v1272_v43 = vcombine.high %v1256_v29, %v1256_v29  ;;  %v1229_v50 = vrot.slane %v1179_v35, %v2505_v62  ;;  %v921_v52 = vcombine.high %v905_v32, %v905_v32  ;;  %v878_v54 = vrot.slane %v828_v36, %v2505_v62 }
  0xda   : > { %v1291_v56 = vsel %vm933_vm0, %v1256_v29, 0.0  ;;  %v941_v40 = vsel %vm933_vm0, %v905_v32, 0.0 }
  0xdb   : > { %v1257_v57 = vmul.f32 %v1229_v50, %v2406_v30  ;;  %v1306_v59 = vsel %vm933_vm0, %v1272_v43, 0.0  ;;  %v906_v60 = vmul.f32 %v878_v54, %v2348_v45  ;;  %v956_v23 = vsel %vm933_vm0, %v921_v52, 0.0 }
  0xdc   : > { %v1183_v28 = vpop.permute.xlu1 %1182  ;;  %v832_v58 = vpop.permute.xlu0 %831  ;;  %v1292_v11 = vadd.f32 %v1291_v56, %v1290_v55  ;;  %v1307_v12 = vadd.f32 %v1306_v59, %v1305_v2  ;;  %v942_v13 = vadd.f32 %v941_v40, %v940_v4  ;;  %v957_v22 = vadd.f32 %v956_v23, %v955_v5 }
  0xdd   : > { %v1236_v63 = vrot.slane %v1183_v28, %v2505_v62  ;;  %v885_v0 = vrot.slane %v832_v58, %v2505_v62  ;;  %v1273_v6 = vcombine.high %v1257_v57, %v1257_v57  ;;  %v1293_v8 = vsel %vm933_vm0, %v1257_v57, 0.0 }
  0xde   : > { %v922_v9 = vcombine.high %v906_v60, %v906_v60  ;;  %v943_v18 = vsel %vm933_vm0, %v906_v60, 0.0  ;;  %v1294_v24 = vadd.f32 %v1293_v8, %v1292_v11 }
  0xdf   : > { %v1258_v10 = vmul.f32 %v1236_v63, %v2417_v38  ;;  %v907_v45 = vmul.f32 %v885_v0, %v2368_v61  ;;  %v1308_v17 = vsel %vm933_vm0, %v1273_v6, 0.0  ;;  %v944_v33 = vadd.f32 %v943_v18, %v942_v13 }
  0xe0   : > { %v1187_v15 = vpop.permute.xlu1 %1186  ;;  %v836_v16 = vpop.permute.xlu0 %835  ;;  %v958_v19 = vsel %vm933_vm0, %v922_v9, 0.0  ;;  %v1309_v32 = vadd.f32 %v1308_v17, %v1307_v12 }
  0xe1   : > { %v1274_v20 = vcombine.high %v1258_v10, %v1258_v10  ;;  %v1295_v25 = vsel %vm933_vm0, %v1258_v10, 0.0  ;;  %v923_v26 = vcombine.high %v907_v45, %v907_v45  ;;  %v945_v27 = vsel %vm933_vm0, %v907_v45, 0.0 }
  0xe2   : > { %v1243_v61 = vrot.slane %v1187_v15, %v2505_v62  ;;  %v892_v29 = vrot.slane %v836_v16, %v2505_v62  ;;  %v959_v34 = vadd.f32 %v958_v19, %v957_v22  ;;  %v1296_v41 = vadd.f32 %v1295_v25, %v1294_v24 }
  0xe3   : > { %v1310_v31 = vsel %vm933_vm0, %v1274_v20, 0.0  ;;  %v960_v35 = vsel %vm933_vm0, %v923_v26, 0.0  ;;  %v946_v48 = vadd.f32 %v945_v27, %v944_v33 }
  0xe4   : > { %v1051_v36 = vpop.permute.xlu1 %1050  ;;  %v1047_v39 = vpop.permute.xlu0 %1046  ;;  %v1259_v42 = vmul.f32 %v1243_v61, %v2422_v47  ;;  %v908_v43 = vmul.f32 %v892_v29, %v2359_v53  ;;  %v1311_v46 = vadd.f32 %v1310_v31, %v1309_v32  ;;  %v961_v50 = vadd.f32 %v960_v35, %v959_v34 }
  0xe5   : > { %v1089_v44 = vrot.slane %v1051_v36, %v2505_v62  ;;  %v1082_v51 = vrot.slane %v1047_v39, %v2505_v62 }
  0xe6   : > { %v1275_v49 = vcombine.high %v1259_v42, %v1259_v42  ;;  %v1297_v52 = vsel %vm933_vm0, %v1259_v42, 0.0  ;;  %v924_v54 = vcombine.high %v908_v43, %v908_v43  ;;  %v947_v55 = vsel %vm933_vm0, %v908_v43, 0.0 }
  0xe7   : > { %v1298_v56 = vadd.f32 %v1297_v52, %v1296_v41  ;;  %v948_v40 = vadd.f32 %v947_v55, %v946_v48  ;;  %v1141_v53 = vmul.f32 %v1089_v44, %v2370_v1  ;;  %v1140_v57 = vmul.f32 %v1082_v51, %v2374_v3 }
  0xe8   : > { %v1059_v28 = vpop.permute.xlu1 %1058  ;;  %v1055_v58 = vpop.permute.xlu0 %1054  ;;  %v1312_v59 = vsel %vm933_vm0, %v1275_v49, 0.0  ;;  %v962_v60 = vsel %vm933_vm0, %v924_v54, 0.0 }
  0xe9   : > { %v1103_v63 = vrot.slane %v1059_v28, %v2505_v62  ;;  %v1096_v0 = vrot.slane %v1055_v58, %v2505_v62  ;;  %v1313_v2 = vadd.f32 %v1312_v59, %v1311_v46  ;;  %v963_v4 = vadd.f32 %v962_v60, %v961_v50  ;;  %1149 = vst [vmem:[%s2635_s22 + $0x8] sm:$0xff] %v1141_v53 }
  0xea   : > { %1148 = vst [vmem:[%s2635_s22] sm:$0xff] %v1140_v57  ;;  %v965_v5 = vadd.f32 %v2593_v37, %v948_v40  ;;  %v1314_v9 = vadd.f32 %v1298_v56, %v2593_v37 }
  0xeb   : > { %v1143_v1 = vmul.f32 %v1103_v63, %v2392_v14  ;;  %v1142_v3 = vmul.f32 %v1096_v0, %v2383_v7  ;;  %v966_v6 = vadd.f32 %v2593_v37, %v963_v4  ;;  %v1315_v10 = vadd.f32 %v1313_v2, %v2593_v37 }
  0xec   : > { %v1067_v23 = vpop.permute.xlu1 %1066  ;;  %v1063_v8 = vpop.permute.xlu0 %1062 }
  0xed   : > { %1151 = vst [vmem:[%s2635_s22 + $0x18] sm:$0xff] %v1143_v1  ;;  %1150 = vst [vmem:[%s2635_s22 + $0x10] sm:$0xff] %v1142_v3  ;;  %v1117_v7 = vrot.slane %v1067_v23, %v2505_v62  ;;  %v1110_v14 = vrot.slane %v1063_v8, %v2505_v62  ;;  %v969_v11 = vcombine.low %v965_v5, %v966_v6 }
  0xee   : > { %v1318_v12 = vcombine.low %v1314_v9, %v1315_v10 }
  0xef   : > { %v1145_v37 = vmul.f32 %v1117_v7, %v2406_v30  ;;  %v1144_v13 = vmul.f32 %v1110_v14, %v2399_v21  ;;  %971 = vst [vmem:[%s2666_s20] sm:$0xff] %v969_v11 }
  0xf0   : > { %v1075_v45 = vpop.permute.xlu1 %1074  ;;  %v1071_v15 = vpop.permute.xlu0 %1070  ;;  %1320 = vst [vmem:[%s573_s18] sm:$0xff] %v1318_v12 }
  0xf1   : > { %1153 = vst [vmem:[%s2635_s22 + $0x28] sm:$0xff] %v1145_v37  ;;  %1152 = vst [vmem:[%s2635_s22 + $0x20] sm:$0xff] %v1144_v13  ;;  %v1131_v16 = vrot.slane %v1075_v45, %v2505_v62  ;;  %v1124_v30 = vrot.slane %v1071_v15, %v2505_v62 }
  0xf2   : > { %2000 = shalt.err (!%p1997_p5)
}
  0xf3   : > { %s2001_s30 = scalar_lea.hbm %s2657_s27, 128  ;;  %s2005_s3 = scalar_lea.hbm %s2807_s12, 256 }
  0xf4   : > { %p2002_p6 = scmp.ne.s32.totalorder %s2657_s27, %s2001_s30  ;;  %p2006_p10 = scmp.lt.u32.totalorder %s2657_s27, %s2807_s12 }
  0xf5   : > { %p2007_p11 = scmp.lt.u32.totalorder %s2005_s3, %s2001_s30  ;;  %p2009_p13 = scmp.lt.u32.totalorder %s2001_s30, %s2657_s27 }
  0xf6   : > { %p2003_p7 = pnand %p2002_p6, %p2255_p4 }
  0xf7   : > { %p2008_p12 = por %p2007_p11, %p2006_p10 }
  0xf8   : > { %p2004_p9 = pneg %p2003_p7 }
  0xf9   : > { %p2010_p0 = por %p2009_p13, %p2008_p12 }
  0xfb   : > { %p2011_p1 = pnand %p2010_p0, %p2004_p9 }
  0xfd   : > { %2014 = shalt.err (!%p2011_p1)
}
  0xfe   : > { %1822 = dma.vmem_to_hbm [thread:$0]  (%p2255_p4), %s2659_s8, 128, %s2657_s27, %s1347_s21   ;;  %v1147_v21 = vmul.f32 %v1131_v16, %v2422_v47  ;;  %v1146_v62 = vmul.f32 %v1124_v30, %v2417_v38 }
  0xff   : > { %s2702_s15 = scalar_lea.hbm %s2805_s10, %s2431_s19  ;;  %s2713_s8 = scalar_lea.hbm %s2806_s11, %s1815_s0 }
 0x100   : > { %1155 = vst [vmem:[%s2635_s22 + $0x38] sm:$0xff] %v1147_v21  ;;  %1154 = vst [vmem:[%s2635_s22 + $0x30] sm:$0xff] %v1146_v62  ;;  %s1337_s27 = scalar_lea.sflag [#allocation9], %s2428_s5  ;;  %s2015_s19 = scalar_lea.vmem %s2706_s6, 1024 }
 0x101   : > { %p2016_p2 = scmp.ne.s32.totalorder %s2706_s6, %s2015_s19  ;;  %s2143_s26 = smov [#allocation8]  }
 0x102   : > { %s2019_s21 = sshll.u32 %s2143_s26, 4  ;;  %s2020_s21 = int_to_ptr.vmem [resolvable:$false] %s2019_s21 }
 0x103   : > { %p2017_p3 = pnand %p2016_p2, %p2255_p4  ;;  %s2021_s18 = scalar_lea.vmem %s2020_s21, 2048 }
 0x104   : > { %p2022_p6 = scmp.lt.s32.totalorder %s2706_s6, %s2020_s21  ;;  %p2023_p7 = scmp.lt.s32.totalorder %s2021_s18, %s2015_s19 }
 0x105   : > { %p2018_p5 = pneg %p2017_p3 }
 0x106   : > { %p2024_p9 = por %p2023_p7, %p2022_p6 }
 0x108   : > { %p2025_p10 = pnand %p2024_p9, %p2018_p5 }
 0x10a   : > { %2028 = shalt.err (!%p2025_p10)
}
 0x10b   : > { %s2029_s22 = scalar_lea.hbm %s2702_s15, 1024  ;;  %s2033_s3 = scalar_lea.hbm %s2805_s10, 2048 }
 0x10c   : > { %p2030_p11 = scmp.ne.s32.totalorder %s2702_s15, %s2029_s22  ;;  %p2034_p0 = scmp.lt.u32.totalorder %s2702_s15, %s2805_s10 }
 0x10d   : > { %p2035_p1 = scmp.lt.u32.totalorder %s2033_s3, %s2029_s22  ;;  %p2037_p3 = scmp.lt.u32.totalorder %s2029_s22, %s2702_s15 }
 0x10e   : > { %p2031_p12 = pnand %p2030_p11, %p2255_p4 }
 0x10f   : > { %p2036_p2 = por %p2035_p1, %p2034_p0 }
 0x110   : > { %p2032_p13 = pneg %p2031_p12 }
 0x111   : > { %p2038_p5 = por %p2037_p3, %p2036_p2 }
 0x113   : > { %p2039_p6 = pnand %p2038_p5, %p2032_p13 }
 0x115   : > { %2042 = shalt.err (!%p2039_p6)
}
 0x116   : > { %s2835_s13 = smov 8   ;;  %s2836_s2 = smov 128  }
 0x117   : > { %1820 = dma.vmem_to_hbm [thread:$0]  (%p2255_p4), %s2706_s6, 1024, %s2702_s15, %s1337_s27, %s2836_s2, %s2836_s2, %s2835_s13  }
 0x118   : > { %s2043_s30 = scalar_lea.vmem %s2717_s1, 128  ;;  %s2144_s19 = smov [#allocation10]  }
 0x119   : > { %p2044_p7 = scmp.ne.s32.totalorder %s2717_s1, %s2043_s30  ;;  %s2047_s26 = sshll.u32 %s2144_s19, 4  ;;  %s2048_s26 = int_to_ptr.vmem [resolvable:$false] %s2047_s26 }
 0x11a   : > { %s2049_s21 = scalar_lea.vmem %s2048_s26, 256  ;;  %p2050_p11 = scmp.lt.s32.totalorder %s2717_s1, %s2048_s26 }
 0x11b   : > { %p2045_p9 = pnand %p2044_p7, %p2255_p4  ;;  %p2051_p12 = scmp.lt.s32.totalorder %s2049_s21, %s2043_s30 }
 0x11d   : > { %p2046_p10 = pneg %p2045_p9  ;;  %p2052_p13 = por %p2051_p12, %p2050_p11 }
 0x11f   : > { %p2053_p0 = pnand %p2052_p13, %p2046_p10 }
 0x121   : > { %2056 = shalt.err (!%p2053_p0)
}
 0x122   : > { %s2057_s6 = scalar_lea.hbm %s2713_s8, 128  ;;  %s2061_s22 = scalar_lea.hbm %s2806_s11, 256 }
 0x123   : > { %p2058_p1 = scmp.ne.s32.totalorder %s2713_s8, %s2057_s6  ;;  %p2062_p5 = scmp.lt.u32.totalorder %s2713_s8, %s2806_s11 }
 0x124   : > { %p2063_p6 = scmp.lt.u32.totalorder %s2061_s22, %s2057_s6  ;;  %p2065_p9 = scmp.lt.u32.totalorder %s2057_s6, %s2713_s8 }
 0x125   : > { %p2059_p2 = pnand %p2058_p1, %p2255_p4 }
 0x126   : > { %p2064_p7 = por %p2063_p6, %p2062_p5 }
 0x127   : > { %p2060_p3 = pneg %p2059_p2 }
 0x128   : > { %p2066_p10 = por %p2065_p9, %p2064_p7 }
 0x12a   : > { %p2067_p11 = pnand %p2066_p10, %p2060_p3 }
 0x12c   : > { %2070 = shalt.err (!%p2067_p11)
}
 0x12d   : > { %1821 = dma.vmem_to_hbm [thread:$0]  (%p2255_p4), %s2717_s1, 128, %s2713_s8, %s1337_s27  }
 0x12e PF: > { %p1848_p12 = scmp.ge.s32.totalorder %s2133_s28, 2  ;;  %s1463_s3 = sand.u32 1, %s2113_s23  }
 0x12f   : > { %s1464_s29 = scalar_lea.sflag [#allocation4], %s1463_s3 }
 0x130   : > { %p1830_p13 = pnand %p1848_p12, %p2264_p8 }
 0x132   : > { %2096 = dma.done.wait (!%p1830_p13), %s1464_s29, 1024  }
 0x133   : > { %2098 = vsyncadd (!%p1830_p13), %s1464_s29, 4294966272  ;;  %s2837_s4 = sadd.s32 4294967294, %s2133_s28  }
 0x134   : > { %s1472_s13 = sand.u32 1, %s2837_s4  }
 0x135   : > { %s1473_s14 = scalar_lea.sflag [#allocation6], %s1472_s13 }
 0x136   : > { %2100 = dma.done.wait (!%p1830_p13), %s1473_s14, 2048  }
 0x137   : > { %2102 = vsyncadd (!%p1830_p13), %s1473_s14, 4294965248  ;;  %s1491_s5 = scalar_lea.sflag [#allocation9], %s1472_s13 }
 0x138   : > { %2104 = dma.done.wait (!%p1830_p13), %s1491_s5, 1152  }
 0x139   : > { %2106 = vsyncadd (!%p1830_p13), %s1491_s5, 4294966144  ;;  %s1509_s1 = scalar_lea.sflag [#allocation12], %s1463_s3 }
 0x13a   : > { %2108 = dma.done.wait (!%p1830_p13), %s1509_s1, 128  }
 0x13b   : > { %2110 = vsyncadd (!%p1830_p13), %s1509_s1, 4294967168  ;;  %s36_s28 = sadd.s32 1, %s2133_s28   ;;  %s2838_s26 = sld [smem:[#allocation17_spill]] }
 0x13c   : > { %p33_p4 = scmp.ge.s32.totalorder %s36_s28, 4   ;;  %s2839_s27 = sld [smem:[#allocation18_spill]] }
 0x13d   : > { %s2840_s23 = smov %s2117_s24  ;;  %s2841_s24 = smov %s2121_s25 }
 0x13e   : > { %s2842_s25 = smov %s2270_s17  ;;  %35 = sbr.rel (!%p33_p4) target bundleno = 19 (0x13), region = 179 }
 0x145   :  { %1514 = vsyncpa [#allocation4], 1 }
 0x146   :  { %1516 = vsyncpa [#allocation4 + $0x1], 1 }
 0x147   :  { %1517 = vsyncpa [#allocation6], 1 }
 0x148   :  { %1519 = vsyncpa [#allocation6 + $0x1], 1 }
 0x149   :  { %1520 = vsyncpa [#allocation9], 1 }
 0x14a   :  { %1522 = vsyncpa [#allocation9 + $0x1], 1 }
 0x14b   :  { %1523 = vsyncpa [#allocation12], 1 }
 0x14c   :  { %1525 = vsyncpa [#allocation12 + $0x1], 1 }

</bundles_post_ra>
